<compile_context>
chip_gen: v7x
topology: tpu7x:2x2x1
jax: 0.10.0
libtpu: 0.0.40
codegen_flags: <defaults>
</compile_context>

<pallas_src>
import jax
import jax.numpy as jnp
from jax.experimental import pallas as pl
from jax.experimental.pallas import tpu as pltpu


def _feature_embed_kernel(x_ref, w2_ref, b2_ref, out_ref):
    # x_ref:   (TB, F)      batch tile of inputs
    # w2_ref:  (F, F*E)     block-structured weight (resident across grid steps)
    # b2_ref:  (1, F*E)     flattened bias
    # out_ref: (TB, F*E)    lane-dense output slab
    x = x_ref[...]
    out_ref[...] = (
        jnp.dot(
            x,
            w2_ref[...],
            precision=jax.lax.Precision.HIGHEST,
            preferred_element_type=jnp.float32,
        )
        + b2_ref[...]
    ).astype(out_ref.dtype)


def pack_block_params(w, b):
    """Pack per-feature params into the block-structured matmul form.

    w: (F, E) with w[i, d] = W_i[d, 0];  b: (F, E).
    Returns W2: (F, F*E) with W2[i, i*E + d] = w[i, d] (zeros elsewhere)
    and b2: (1, F*E) = b.reshape(1, F*E).
    Done once at init time -- not inside the kernel.
    """
    F, E = w.shape
    eye = jnp.eye(F, dtype=w.dtype)                       # (F, F)
    w2 = (eye[:, :, None] * w[:, None, :]).reshape(F, F * E)
    b2 = b.reshape(1, F * E)
    return w2, b2


def feature_embedding(x, w2, b2, *, block_b=1024):
    """x: (B, F), w2: (F, F*E), b2: (1, F*E) -> (B, F, E) float32."""
    B, F = x.shape
    F2, FE = w2.shape
    assert F == F2 and FE % F == 0 and b2.shape == (1, FE)
    E = FE // F

    # Batch tile: either the full batch (small B) or a multiple-of-8 tile
    # (sublane-aligned).  w2/b2 blocks equal their full array shapes, so the
    # (8,128) rule is satisfied for every operand.
    if B <= block_b:
        tb = B
    else:
        tb = block_b  # multiple of 8; last block is masked by Pallas if ragged
    grid = (pl.cdiv(B, tb),)

    out2d = pl.pallas_call(
        _feature_embed_kernel,
        out_shape=jax.ShapeDtypeStruct((B, FE), x.dtype),
        grid_spec=pltpu.PrefetchScalarGridSpec(
            num_scalar_prefetch=0,
            grid=grid,
            in_specs=[
                pl.BlockSpec((tb, F), lambda i: (i, 0)),     # batch tile of x
                pl.BlockSpec((F, FE), lambda i: (0, 0)),     # resident weights
                pl.BlockSpec((1, FE), lambda i: (0, 0)),     # resident bias
            ],
            out_specs=pl.BlockSpec((tb, FE), lambda i: (i, 0)),
        ),
        compiler_params=pltpu.CompilerParams(
            dimension_semantics=("parallel",),
        ),
    )(x, w2, b2)

    # Free layout plumbing back to the PyTorch output shape.
    return out2d.reshape(B, F, E)


def init_params(key, num_features=13, embed_dim=16, dtype=jnp.float32):
    """Deterministic init mimicking nn.Linear(1, embed_dim) per feature.

    PyTorch: W ~ U(-1, 1) (bound = 1/sqrt(in_features), in_features=1), same for
    bias.  W_i has shape (embed_dim, 1); we pack w[i, d] = W_i[d, 0].
    """
    kw, kb = jax.random.split(key)
    bound = 1.0
    w = jax.random.uniform(kw, (num_features, embed_dim), dtype, -bound, bound)
    b = jax.random.uniform(kb, (num_features, embed_dim), dtype, -bound, bound)
    return w, b


def feature_embedding_ref(x, w, b):
    # Pure-JAX reference of the PyTorch forward.
    return x[:, :, None] * w[None, :, :] + b[None, :, :]


if __name__ == "__main__":
    num_features = 13
    embed_dim = 16

    key = jax.random.PRNGKey(0)
    k_x, k_x2, k_p = jax.random.split(key, 3)
    w, b = init_params(k_p, num_features, embed_dim)
    w2, b2 = pack_block_params(w, b)

    # Case 1: tiny batch (single grid step, full-array blocks).
    batch = 2
    x = jax.random.normal(k_x, (batch, num_features), jnp.float32)
    out = jax.block_until_ready(feature_embedding(x, w2, b2))
    ref = feature_embedding_ref(x, w, b)
    assert out.shape == (batch, num_features, embed_dim)
    assert jnp.allclose(out, ref, atol=1e-5, rtol=1e-5)

    # Case 2: larger batch exercising the batch grid (4 tiles of 16 rows).
    batch2 = 64
    x2 = jax.random.normal(k_x2, (batch2, num_features), jnp.float32)
    out2 = jax.block_until_ready(feature_embedding(x2, w2, b2, block_b=16))
    ref2 = feature_embedding_ref(x2, w, b)
    assert out2.shape == (batch2, num_features, embed_dim)
    assert jnp.allclose(out2, ref2, atol=1e-5, rtol=1e-5)

    print("KERNEL_OK")
</pallas_src>

<mosaic_0001>
module attributes {stable_mosaic.version = 11 : i64} {
  func.func @_feature_embed_kernel(%arg0: i32, %arg1: memref<2x13xf32, #tpu.memory_space<vmem>>, %arg2: memref<13x208xf32, #tpu.memory_space<vmem>>, %arg3: memref<1x208xf32, #tpu.memory_space<vmem>>, %arg4: memref<2x208xf32, #tpu.memory_space<vmem>>) attributes {dimension_semantics = [#tpu.dimension_semantics<parallel>], iteration_bounds = array<i64: 1>, scalar_prefetch = 0 : i64, scratch_operands = 0 : i64, tpu.core_type = #tpu.core_type<tc>, window_params = [{transform_indices = @transform_0, window_bounds = array<i64: 2, 13>}, {pipeline_mode = #tpu.pipeline_mode<synchronous>, transform_indices = @transform_1, window_bounds = array<i64: 13, 208>}, {pipeline_mode = #tpu.pipeline_mode<synchronous>, transform_indices = @transform_2, window_bounds = array<i64: 1, 208>}, {transform_indices = @transform_3, window_bounds = array<i64: 2, 208>}]} {
    %c0 = arith.constant 0 : index
    %c0_0 = arith.constant 0 : index
    %0 = vector.load %arg1[%c0, %c0_0] : memref<2x13xf32, #tpu.memory_space<vmem>>, vector<2x13xf32>
    %c0_1 = arith.constant 0 : index
    %c0_2 = arith.constant 0 : index
    %1 = vector.load %arg2[%c0_1, %c0_2] : memref<13x208xf32, #tpu.memory_space<vmem>>, vector<13x208xf32>
    %cst = arith.constant dense<0.000000e+00> : vector<2x208xf32>
    %2 = tpu.matmul %0, %1, %cst {dimension_numbers = #tpu.dot_dimension_numbers<[1], [0], [0], [1], [0, 0, 1, 1], [], []>, precision = #tpu.contract_precision<fp32>} : vector<2x13xf32>, vector<13x208xf32>, vector<2x208xf32> -> vector<2x208xf32>
    %c0_3 = arith.constant 0 : index
    %c0_4 = arith.constant 0 : index
    %3 = vector.load %arg3[%c0_3, %c0_4] : memref<1x208xf32, #tpu.memory_space<vmem>>, vector<1x208xf32>
    %4 = vector.broadcast %3 : vector<1x208xf32> to vector<2x208xf32>
    %5 = arith.addf %2, %4 : vector<2x208xf32>
    %c0_5 = arith.constant 0 : index
    %c0_6 = arith.constant 0 : index
    %6 = vector.load %arg4[%c0_5, %c0_6] : memref<2x208xf32, #tpu.memory_space<vmem>>, vector<2x208xf32>
    tpu.vector_store %arg4[%c0_5, %c0_6], %5 {strides = array<i32>} : memref<2x208xf32, #tpu.memory_space<vmem>>, vector<2x208xf32>,
    return
  }
  func.func @transform_0(%arg0: i32) -> (i32, i32) {
    %c0_i32 = arith.constant 0 : i32
    %c0_i32_0 = arith.constant 0 : i32
    return %arg0, %c0_i32 : i32, i32
  }
  func.func @transform_1(%arg0: i32) -> (i32, i32) {
    %c0_i32 = arith.constant 0 : i32
    %c0_i32_0 = arith.constant 0 : i32
    %c0_i32_1 = arith.constant 0 : i32
    return %c0_i32, %c0_i32_0 : i32, i32
  }
  func.func @transform_2(%arg0: i32) -> (i32, i32) {
    %c0_i32 = arith.constant 0 : i32
    %c0_i32_0 = arith.constant 0 : i32
    %c0_i32_1 = arith.constant 0 : i32
    return %c0_i32, %c0_i32_0 : i32, i32
  }
  func.func @transform_3(%arg0: i32) -> (i32, i32) {
    %c0_i32 = arith.constant 0 : i32
    %c0_i32_0 = arith.constant 0 : i32
    return %arg0, %c0_i32 : i32, i32
  }
}

</mosaic_0001>

<bundles_post_ra>
// kernel: tpu_custom_call.1
= control target key start
LH: loop header
LB: loop body
LE: loop exit
PB: predicated region body
PF: predicated region fallthrough
CT: control target
= control target key end

     0   :  { %8 = vsyncpa [#allocation3], 0  ;;  %s785_s0 = inlined_call_operand.hbm [shape: f32[2,13], index: 0, kind: input, shape index: {}]   ;;  %s786_s1 = inlined_call_operand.hbm [shape: f32[13,208], index: 1, kind: input, shape index: {}]   ;;  %s787_s2 = inlined_call_operand.vmem [shape: f32[1,208], index: 2, kind: input, shape index: {}]   ;;  %s788_s3 = inlined_call_operand.hbm [shape: f32[2,208], index: 3, kind: output, shape index: {}]  }
   0x1   :  { %9 = vsyncpa [#allocation6], 0 }
   0x2   :  { %10 = vsyncpa [#allocation4], 0  ;;  %s706_s12 = smov [#allocation2]   ;;  %s707_s14 = smov [#allocation5]  }
   0x3   :  { %s17_s13 = sshll.u32 %s706_s12, 4  ;;  %s26_s15 = sshll.u32 %s707_s14, 4  ;;  %s18_s13 = int_to_ptr.vmem [resolvable:$true] %s17_s13  ;;  %s733_s15 = int_to_ptr.vmem [resolvable:$true] %s26_s15 }
   0x4   :  { %s634_s18 = scalar_lea.hbm %s785_s0, 32 }
   0x5   :  { %p635_p0 = scmp.ne.s32.totalorder %s785_s0, %s634_s18  ;;  %p638_p1 = scmp.lt.u32.totalorder %s634_s18, %s785_s0 }
   0x7   :  { %p640_p2 = pnand %p638_p1, %p635_p0 }
   0x9   :  { %643 = shalt.err (!%p640_p2)
}
   0xa   :  { %s644_s23 = scalar_lea.vmem %s18_s13, 32  ;;  %p649_p4 = scmp.lt.s32.totalorder %s18_s13, %s18_s13 }
   0xb   :  { %p645_p3 = scmp.ne.s32.totalorder %s18_s13, %s644_s23  ;;  %p650_p5 = scmp.lt.s32.totalorder %s644_s23, %s644_s23 }
   0xd   :  { %p651_p6 = por %p650_p5, %p649_p4 }
   0xf   :  { %p652_p7 = pnand %p651_p6, %p645_p3 }
  0x11   :  { %655 = shalt.err (!%p652_p7)
}
  0x12   :  { %20 = dma.hbm_to_vmem [thread:$0]  %s785_s0, 32, %s18_s13, [#allocation3]  }
  0x13   :  { %s656_s28 = scalar_lea.hbm %s786_s1, 512 }
  0x14   :  { %p657_p8 = scmp.ne.s32.totalorder %s786_s1, %s656_s28  ;;  %p660_p9 = scmp.lt.u32.totalorder %s656_s28, %s786_s1 }
  0x16   :  { %p662_p10 = pnand %p660_p9, %p657_p8 }
  0x18   :  { %665 = shalt.err (!%p662_p10)
}
  0x19   :  { %s666_s6 = scalar_lea.vmem %s733_s15, 512  ;;  %p671_p12 = scmp.lt.s32.totalorder %s733_s15, %s733_s15 }
  0x1a   :  { %p667_p11 = scmp.ne.s32.totalorder %s733_s15, %s666_s6  ;;  %p672_p13 = scmp.lt.s32.totalorder %s666_s6, %s666_s6 }
  0x1c   :  { %p673_p0 = por %p672_p13, %p671_p12 }
  0x1e   :  { %p674_p1 = pnand %p673_p0, %p667_p11 }
  0x20   :  { %677 = shalt.err (!%p674_p1)
}
  0x21   :  { %s708_s0 = smov 256   ;;  %s709_s7 = smov 16  }
  0x22   :  { %32 = dma.hbm_to_vmem [thread:$0]  %s786_s1, 512, %s733_s15, [#allocation6], %s708_s0, %s708_s0, %s709_s7  }
  0x23   :  { %700 = dma.done.wait [#allocation3], 32  }
  0x24   :  { %701 = vsyncadd [#allocation3], 4294967264 }
  0x25   :  { %702 = dma.done.wait [#allocation6], 512  }
  0x26   :  { %703 = vsyncadd [#allocation6], 4294966784  ;;  %v710_v0 = vmov 0.0   ;;  %vm62_vm0 = vcmask 1044480   ;;  %v43_v1 = vld [vmem:[#allocation5 + $0x8] sm:$0xff]  ;;  %v42_v3 = vld [vmem:[#allocation5] sm:$0xff]  ;;  %v48_v42 = vlaneseq }
  0x27   :  { %390 = vmatprep.mubr.f32.mxu0 %v710_v0  ;;  %137 = vmatprep.mubr.f32.mxu1 %v710_v0  ;;  %v45_v2 = vld [vmem:[#allocation5 + $0x18] sm:$0x1f]  ;;  %vm58_vm1 = vcmask 105472   ;;  %v69_v5 = vand.u32 4294901760, %v43_v1  ;;  %v44_v6 = vld [vmem:[#allocation5 + $0x10] sm:$0x1f] }
  0x28   :  { %v67_v4 = vsel %vm62_vm0, %v45_v2, 0  ;;  %v71_v7 = vand.u32 4294901760, %v42_v3  ;;  %v64_v9 = vsel %vm62_vm0, %v44_v6, 0  ;;  %v41_v10 = vld [vmem:[#allocation2] sm:$0x3]  ;;  %v49_v43 = vshrl.u32 %v48_v42, 7 }
  0x29   :  { %v73_v8 = vand.u32 4294901760, %v67_v4  ;;  %v150_v11 = vsub.f32 %v43_v1, %v69_v5  ;;  %v75_v12 = vand.u32 4294901760, %v64_v9  ;;  %v60_v14 = vsel %vm58_vm1, %v41_v10, 0  ;;  %v46_v45 = vld [vmem:[%s787_s2] sm:$0x3]  ;;  %s712_s11 = smov [#allocation7]  }
  0x2a   :  { %v156_v13 = vsub.f32 %v42_v3, %v71_v7  ;;  %v138_v17 = vand.u32 4294901760, %v60_v14  ;;  %v50_v44 = vsub.s32 0, %v49_v43  ;;  %v54_v46 = vsub.s32 1, %v49_v43  ;;  %s581_s12 = sshll.u32 %s712_s11, 4  ;;  %s582_s12 = int_to_ptr.vmem [resolvable:$true] %s581_s12 }
  0x2b   :  { %v591_v15 = vpack.c.bf16 %v73_v8, %v69_v5  ;;  %v162_v16 = vsub.f32 %v67_v4, %v73_v8  ;;  %v593_v18 = vpack.c.bf16 %v75_v12, %v71_v7  ;;  %v168_v19 = vsub.f32 %v64_v9, %v75_v12  ;;  %s678_s2 = scalar_lea.vmem %s582_s12, 64  ;;  %p683_p3 = scmp.lt.s32.totalorder %s582_s12, %s582_s12 }
  0x2c   :  { %v151_v20 = vand.u32 4294901760, %v150_v11  ;;  %v157_v21 = vand.u32 4294901760, %v156_v13  ;;  %v139_v22 = vsub.f32 %v60_v14, %v138_v17  ;;  %v711_v48 = vmov 1983009808   ;;  %p679_p2 = scmp.ne.s32.totalorder %s582_s12, %s678_s2  ;;  %p684_p4 = scmp.lt.s32.totalorder %s678_s2, %s678_s2 }
  0x2d   :  { %604 = vmatprep.subr.bf16.mxu0 %v591_v15  ;;  %592 = vmatprep.subr.bf16.mxu1 %v591_v15  ;;  %v163_v23 = vand.u32 4294901760, %v162_v16  ;;  %v169_v26 = vand.u32 4294901760, %v168_v19  ;;  %v599_v39 = vpack.c.bf16 %v162_v16, %v150_v11  ;;  %v601_v41 = vpack.c.bf16 %v168_v19, %v156_v13 }
  0x2e   :  { %606 = vmatpush1.bf16.msra.mxu0 %v593_v18  ;;  %594 = vmatpush1.bf16.msra.mxu1 %v593_v18  ;;  %v152_v24 = vsub.f32 %v150_v11, %v151_v20  ;;  %v158_v25 = vsub.f32 %v156_v13, %v157_v21  ;;  %v140_v27 = vand.u32 4294901760, %v139_v22  ;;  %v564_v49 = vunpack.c.l.s4 %v711_v48  ;;  %p685_p5 = por %p684_p4, %p683_p3 }
  0x2f   :  { %v164_v28 = vsub.f32 %v162_v16, %v163_v23  ;;  %v607_v29 = vpack.c.bf16 %v163_v23, %v151_v20  ;;  %v170_v32 = vsub.f32 %v168_v19, %v169_v26  ;;  %v609_v33 = vpack.c.bf16 %v169_v26, %v157_v21 }
  0x30   :  { %v153_v30 = vand.u32 4294901760, %v152_v24  ;;  %v159_v31 = vand.u32 4294901760, %v158_v25  ;;  %v141_v34 = vsub.f32 %v139_v22, %v140_v27  ;;  %v51_v51 = vrot.slane %v46_v45, %v50_v44  ;;  %p686_p6 = pnand %p685_p5, %p679_p2 }
  0x31   :  { %394 = vmatmul.mubr.f32.vlgmr.msra.gmra.mrb[0].mxu0 %v140_v27  ;;  %v165_v35 = vand.u32 4294901760, %v164_v28  ;;  %608 = vmatprep.subr.bf16.mxu0 %v607_v29  ;;  %v171_v36 = vand.u32 4294901760, %v170_v32  ;;  %v55_v52 = vrot.slane %v46_v45, %v54_v46  ;;  %v565_v54 = vunpack.c.0.s8 %v564_v49 }
  0x32   :  { %610 = vmatpush1.bf16.msra.mxu0 %v609_v33  ;;  %476 = vmatprep.mubr.f32.mxu0 %v710_v0  ;;  %v142_v37 = vand.u32 4294901760, %v141_v34  ;;  %vm571_vm2 = vcmask 1041408   ;;  %vm572_vm3 = vcmask 650242  }
  0x33   :  { %v595_v38 = vpack.c.bf16 %v165_v35, %v153_v30  ;;  %612 = vmatprep.subr.bf16.mxu0 %v591_v15  ;;  %v597_v40 = vpack.c.bf16 %v171_v36, %v159_v31  ;;  %v568_v60 = vsub.s32 %v565_v54, %v49_v43  ;;  %vm573_vm4 = vmor %vm572_vm3, %vm571_vm2 }
  0x34   :  { %143 = vmatmul.mubr.f32.vlgmr.msra.gmra.mrb[0].mxu1 %v142_v37 }
  0x35   :  { %596 = vmatprep.subr.bf16.mxu1 %v595_v38  ;;  %233 = vmatprep.mubr.f32.mxu1 %v710_v0 }
  0x36   :  { %598 = vmatpush1.bf16.msra.mxu1 %v597_v40 }
  0x37   :  { %600 = vmatprep.subr.bf16.mxu1 %v599_v39 }
  0x39   :  { %478 = vmatmul.mubr.f32.vlgmr.msra.gmra.mrb[0].mxu0 %v138_v17 }
  0x3a   :  { %614 = vmatpush1.bf16.msra.mxu0 %v593_v18  ;;  %552 = vmatprep.mubr.f32.mxu0 %v710_v0 }
  0x3c   :  { %235 = vmatmul.mubr.f32.vlgmr.msra.gmra.mrb[0].mxu1 %v138_v17 }
  0x3d   :  { %602 = vmatpush1.bf16.msra.mxu1 %v601_v41  ;;  %313 = vmatprep.mubr.f32.mxu1 %v710_v0 }
  0x41   :  { %554 = vmatmul.mubr.f32.vlgmr.msra.gmra.mrb[0].mxu0 %v138_v17 }
  0x44   :  { %316 = vmatmul.mubr.f32.vlgmr.msra.gmra.mrb[0].mxu1 %v139_v22 }
 0x114   :  { %v555_v47 = vpop.f32.mrb[0].mxu0 }
 0x115   :  { %v557_v50 = vpop.f32.mrb[1].mxu0 }
 0x117   :  { %v317_v53 = vpop.f32.mrb[0].mxu1 }
 0x118   :  { %v615_v55 = vadd.f32 %v317_v53, %v51_v51  ;;  %v319_v56 = vpop.f32.mrb[1].mxu1 }
 0x119   :  { %v617_v57 = vadd.f32 %v319_v56, %v55_v52 }
 0x11a   :  { %v616_v58 = vadd.f32 %v615_v55, %v555_v47 }
 0x11b   :  { %v618_v59 = vadd.f32 %v617_v57, %v557_v50 }
 0x11d   :  { %v562_v61 = vcombine.low %v616_v58, %v618_v59 }
 0x11f   :  { %v569_v62 = vrot.slane %v562_v61, %v568_v60 }
 0x121   :  { %574 = vst.msk [vmem:[#allocation7] sm:$0xf] %vm573_vm4, %v569_v62 }
 0x122   :  { %689 = shalt.err (!%p686_p6)
}
 0x123   :  { %s690_s15 = scalar_lea.hbm %s788_s3, 64 }
 0x124   :  { %p691_p7 = scmp.ne.s32.totalorder %s788_s3, %s690_s15  ;;  %p694_p8 = scmp.lt.u32.totalorder %s690_s15, %s788_s3 }
 0x126   :  { %p696_p9 = pnand %p694_p8, %p691_p7 }
 0x128   :  { %699 = shalt.err (!%p696_p9)
}
 0x129   :  { %584 = dma.vmem_to_hbm [thread:$0]  %s582_s12, 64, %s788_s3, [#allocation4]  }
 0x12a   :  { %704 = dma.done.wait [#allocation4], 64  }
 0x12b   :  { %705 = vsyncadd [#allocation4], 4294967232 }
 0x12c   :  { %588 = vsyncpa [#allocation3], 1 }
 0x12d   :  { %589 = vsyncpa [#allocation6], 1 }
 0x12e   :  { %590 = vsyncpa [#allocation4], 1 }

</bundles_post_ra>
